<compile_context>
chip_gen: v6e
topology: v6e:2x2x1
jax: 0.10.0
libtpu: 0.0.40
codegen_flags: <defaults>
</compile_context>

<pallas_src>
import functools

import jax
import jax.numpy as jnp
from jax.experimental import pallas as pl
from jax.experimental.pallas import tpu as pltpu


_TILE_BUDGET_BYTES = 12 * 1024 * 1024   # one (input+output) tile set; ~2x when double-buffered
_VMEM_LIMIT_BYTES = 40 * 1024 * 1024    # safe on v5e/v6e (128 MiB) and v7x (64 MiB) VMEM


def _round_up(v, m):
    return -(-v // m) * m


def _largest_divisor_leq(n, cap):
    """Largest divisor of n that is <= cap (always >= 1)."""
    best = 1
    d = 1
    while d * d <= n:
        if n % d == 0:
            for q in (d, n // d):
                if q <= cap and q > best:
                    best = q
        d += 1
    return best


def _largest_flat_divisor(n, cap):
    """Largest divisor of n that is <= cap and is a multiple of 8 or equal to n.

    (Sublane-dim layout rule for a 2-D block whose second-to-last dim is the block.)
    Returns None if no such divisor exists.
    """
    best = None
    d = 1
    while d * d <= n:
        if n % d == 0:
            for q in (d, n // d):
                if q <= cap and (q % 8 == 0 or q == n):
                    if best is None or q > best:
                        best = q
        d += 1
    return best


def _zero_pad_kernel(x_ref, o_ref, *, pad_h, pad_w, H, W):
    """General path. x_ref: (Cb, H, W), o_ref: (Cb, Ho, Wo). Each element stored once."""
    Wo = W + 2 * pad_w
    cb = x_ref.shape[0]
    dt = o_ref.dtype
    if pad_h > 0:
        band = jnp.zeros((cb, pad_h, Wo), dt)
        o_ref[:, pl.ds(0, pad_h), :] = band                       # top rows
        o_ref[:, pl.ds(pad_h + H, pad_h), :] = band                # bottom rows
    if pad_w > 0:
        col = jnp.zeros((cb, H, pad_w), dt)
        o_ref[:, pl.ds(pad_h, H), pl.ds(0, pad_w)] = col           # left cols
        o_ref[:, pl.ds(pad_h, H), pl.ds(pad_w + W, pad_w)] = col   # right cols
    o_ref[:, pl.ds(pad_h, H), pl.ds(pad_w, W)] = x_ref[...]        # interior, once


def _zero_pad_flat_kernel(x_ref, o_ref, *, pad_len, L):
    """Lane-dense path for pad_w == 0. x_ref: (Cb, L), o_ref: (Cb, L + 2*pad_len)."""
    cb = x_ref.shape[0]
    dt = o_ref.dtype
    if pad_len > 0:
        band = jnp.zeros((cb, pad_len), dt)
        o_ref[:, pl.ds(0, pad_len)] = band
        o_ref[:, pl.ds(pad_len + L, pad_len)] = band
    o_ref[:, pl.ds(pad_len, L)] = x_ref[...]


def zero_pad(x, padding):
    """Equivalent of ZeroPad(padding)(x): pad H by pad_h and W by pad_w on both sides."""
    if isinstance(padding, int):
        pad_h = pad_w = int(padding)
    else:
        pad_h, pad_w = int(padding[0]), int(padding[1])
    assert pad_h >= 0 and pad_w >= 0

    N, C, H, W = x.shape
    Ho, Wo = H + 2 * pad_h, W + 2 * pad_w
    NC = N * C
    dt = x.dtype
    dbytes = jnp.dtype(dt).itemsize
    sub_m = max(8, 32 // dbytes)  # sublane tile multiple for this dtype

    if pad_h == 0 and pad_w == 0:
        return x

    bytes_accessed = (NC * H * W + NC * Ho * Wo) * dbytes
    cost = pl.CostEstimate(flops=0, transcendentals=0, bytes_accessed=bytes_accessed)
    cparams = pltpu.CompilerParams(
        dimension_semantics=("parallel",),
        vmem_limit_bytes=_VMEM_LIMIT_BYTES,
    )

    if pad_w == 0:
        # Lane-dense path: flatten (H, W) -> H*W so the output last dim is wide.
        L, Lo, pad_len = H * W, Ho * W, pad_h * W
        per_plane = (_round_up(L, 128) + _round_up(Lo, 128)) * dbytes
        cap_full = max(1, _TILE_BUDGET_BYTES // per_plane)
        cap_mc = cap_full
        if NC >= 2:
            cap_mc = max(1, min(cap_full, -(-NC // 2)))  # prefer >= 2 grid steps (2 TCs)
        cb = _largest_flat_divisor(NC, cap_mc)
        if cb is None:
            cb = _largest_flat_divisor(NC, cap_full)
        if cb is not None:
            kernel = functools.partial(_zero_pad_flat_kernel, pad_len=pad_len, L=L)
            out = pl.pallas_call(
                kernel,
                out_shape=jax.ShapeDtypeStruct((NC, Lo), dt),
                grid=(NC // cb,),
                in_specs=[pl.BlockSpec((cb, L), lambda i: (i, 0))],
                out_specs=pl.BlockSpec((cb, Lo), lambda i: (i, 0)),
                compiler_params=cparams,
                cost_estimate=cost,
            )(x.reshape(NC, L))
            return out.reshape(N, C, Ho, Wo)
        # else: no layout-legal flat block; fall through to the general path.

    # General path: block many (n, c) planes per grid step; last-two block dims equal
    # the full (H, W) / (Ho, Wo) extents so the (8, 128) rule does not apply.
    per_plane = (_round_up(H, sub_m) * _round_up(W, 128)
                 + _round_up(Ho, sub_m) * _round_up(Wo, 128)) * dbytes
    cap = max(1, _TILE_BUDGET_BYTES // per_plane)
    if NC >= 2:
        cap = max(1, min(cap, -(-NC // 2)))  # keep >= 2 parallel grid steps when possible
    cb = _largest_divisor_leq(NC, cap)

    kernel = functools.partial(_zero_pad_kernel, pad_h=pad_h, pad_w=pad_w, H=H, W=W)
    out = pl.pallas_call(
        kernel,
        out_shape=jax.ShapeDtypeStruct((NC, Ho, Wo), dt),
        grid=(NC // cb,),
        in_specs=[pl.BlockSpec((cb, H, W), lambda i: (i, 0, 0))],
        out_specs=pl.BlockSpec((cb, Ho, Wo), lambda i: (i, 0, 0)),
        compiler_params=cparams,
        cost_estimate=cost,
    )(x.reshape(NC, H, W))
    return out.reshape(N, C, Ho, Wo)


if __name__ == "__main__":
    key = jax.random.PRNGKey(0)
    N, C, H, W = 2, 4, 16, 16
    x = jax.random.normal(key, (N, C, H, W), dtype=jnp.float32)

    # ZeroPad((2, 3)): pad_h=2 on H, pad_w=3 on W (symmetric, zeros).
    out = zero_pad(x, (2, 3))
    jax.block_until_ready(out)
    ref = jnp.pad(x, ((0, 0), (0, 0), (2, 2), (3, 3)))
    assert out.shape == (N, C, H + 4, W + 6)
    assert out.dtype == x.dtype
    assert jnp.array_equal(out, ref)

    # ZeroPad(1): integer padding on both spatial dims.
    out1 = zero_pad(x, 1)
    jax.block_until_ready(out1)
    assert jnp.array_equal(out1, jnp.pad(x, ((0, 0), (0, 0), (1, 1), (1, 1))))

    # ZeroPad((2, 0)): exercises the lane-dense flattened path.
    out2 = zero_pad(x, (2, 0))
    jax.block_until_ready(out2)
    assert jnp.array_equal(out2, jnp.pad(x, ((0, 0), (0, 0), (2, 2), (0, 0))))

    print("KERNEL_OK")
</pallas_src>

<mosaic_0001>
module attributes {stable_mosaic.version = 11 : i64} {
  func.func @_zero_pad_kernel(%arg0: i32, %arg1: memref<4x16x16xf32, #tpu.memory_space<vmem>>, %arg2: memref<4x20x22xf32, #tpu.memory_space<vmem>>) attributes {dimension_semantics = [#tpu.dimension_semantics<parallel>], iteration_bounds = array<i64: 2>, scalar_prefetch = 0 : i64, scratch_operands = 0 : i64, tpu.core_type = #tpu.core_type<tc>, window_params = [{transform_indices = @transform_0, window_bounds = array<i64: 4, 16, 16>}, {transform_indices = @transform_1, window_bounds = array<i64: 4, 20, 22>}]} {
    %cst = arith.constant 0.000000e+00 : f32
    %0 = vector.broadcast %cst : f32 to vector<4x2x22xf32>
    %c0 = arith.constant 0 : index
    %c0_0 = arith.constant 0 : index
    %c0_1 = arith.constant 0 : index
    %1 = vector.load %arg2[%c0, %c0_0, %c0_1] : memref<4x20x22xf32, #tpu.memory_space<vmem>>, vector<4x2x22xf32>
    tpu.vector_store %arg2[%c0, %c0_0, %c0_1], %0 {strides = array<i32>} : memref<4x20x22xf32, #tpu.memory_space<vmem>>, vector<4x2x22xf32>,
    %c0_2 = arith.constant 0 : index
    %c18 = arith.constant 18 : index
    %c0_3 = arith.constant 0 : index
    %2 = vector.load %arg2[%c0_2, %c18, %c0_3] : memref<4x20x22xf32, #tpu.memory_space<vmem>>, vector<4x2x22xf32>
    tpu.vector_store %arg2[%c0_2, %c18, %c0_3], %0 {strides = array<i32>} : memref<4x20x22xf32, #tpu.memory_space<vmem>>, vector<4x2x22xf32>,
    %cst_4 = arith.constant 0.000000e+00 : f32
    %3 = vector.broadcast %cst_4 : f32 to vector<4x16x3xf32>
    %c0_5 = arith.constant 0 : index
    %c2 = arith.constant 2 : index
    %c0_6 = arith.constant 0 : index
    %4 = vector.load %arg2[%c0_5, %c2, %c0_6] : memref<4x20x22xf32, #tpu.memory_space<vmem>>, vector<4x16x3xf32>
    tpu.vector_store %arg2[%c0_5, %c2, %c0_6], %3 {strides = array<i32>} : memref<4x20x22xf32, #tpu.memory_space<vmem>>, vector<4x16x3xf32>,
    %c0_7 = arith.constant 0 : index
    %c2_8 = arith.constant 2 : index
    %c19 = arith.constant 19 : index
    %5 = vector.load %arg2[%c0_7, %c2_8, %c19] : memref<4x20x22xf32, #tpu.memory_space<vmem>>, vector<4x16x3xf32>
    tpu.vector_store %arg2[%c0_7, %c2_8, %c19], %3 {strides = array<i32>} : memref<4x20x22xf32, #tpu.memory_space<vmem>>, vector<4x16x3xf32>,
    %c0_9 = arith.constant 0 : index
    %c0_10 = arith.constant 0 : index
    %c0_11 = arith.constant 0 : index
    %6 = vector.load %arg1[%c0_9, %c0_10, %c0_11] : memref<4x16x16xf32, #tpu.memory_space<vmem>>, vector<4x16x16xf32>
    %c0_12 = arith.constant 0 : index
    %c2_13 = arith.constant 2 : index
    %c3 = arith.constant 3 : index
    %7 = vector.load %arg2[%c0_12, %c2_13, %c3] : memref<4x20x22xf32, #tpu.memory_space<vmem>>, vector<4x16x16xf32>
    tpu.vector_store %arg2[%c0_12, %c2_13, %c3], %6 {strides = array<i32>} : memref<4x20x22xf32, #tpu.memory_space<vmem>>, vector<4x16x16xf32>,
    return
  }
  func.func @transform_0(%arg0: i32) -> (i32, i32, i32) {
    %c0_i32 = arith.constant 0 : i32
    %c0_i32_0 = arith.constant 0 : i32
    %c0_i32_1 = arith.constant 0 : i32
    return %arg0, %c0_i32, %c0_i32_0 : i32, i32, i32
  }
  func.func @transform_1(%arg0: i32) -> (i32, i32, i32) {
    %c0_i32 = arith.constant 0 : i32
    %c0_i32_0 = arith.constant 0 : i32
    %c0_i32_1 = arith.constant 0 : i32
    return %arg0, %c0_i32, %c0_i32_0 : i32, i32, i32
  }
}

</mosaic_0001>

<bundles_post_ra>
// kernel: tpu_custom_call.1
= control target key start
LH: loop header
LB: loop body
LE: loop exit
PB: predicated region body
PF: predicated region fallthrough
CT: control target
= control target key end

     0   :  { %6 = vsyncpa [#allocation3], 0  ;;  %s610_s0 = inlined_call_operand.hbm [shape: f32[8,16,16], index: 0, kind: input, shape index: {}]   ;;  %s611_s1 = inlined_call_operand.vmem [shape: f32[8,20,22], index: 1, kind: output, shape index: {}]  }
   0x1   :  { %8 = vsyncpa [#allocation3 + $0x1], 0  ;;  %s426_s6 = smov 0   ;;  %s428_s7 = smov 0  }
   0x2   :  { %s430_s8 = smov 0   ;;  %s432_s9 = smov 0  }
   0x3 LB: > { %s287_s10 = sadd.s32 4294967295, %s409_s9   ;;  %s446_s11 = sadd.s32 1, %s409_s9   ;;  %s409_s9 = sphi %s432_s9, %s620_s9   ;;  %s405_s8 = sphi %s430_s8, %s619_s8   ;;  %s401_s7 = sphi %s428_s7, %s618_s7   ;;  %s397_s6 = sphi %s426_s6, %s617_s6  }
   0x4   : > { %s18_s12 = ssub.s32 %s409_s9, %s446_s11  ;;  %s21_s13 = sadd.s32 1, %s405_s8 }
   0x5   : > { %p19_p0 = scmp.eq.s32.totalorder %s18_s12, 0  ;;  %p28_p1 = scmp.ne.s32.totalorder %s405_s8, %s401_s7 }
   0x6   : > { %p29_p2 = scmp.eq.s32.totalorder %s409_s9, 0  ;;  %p34_p3 = scmp.ne.s32.totalorder %s401_s7, %s397_s6 }
   0x7   : > { %s456_s14 = scalar_select %p19_p0, %s405_s8, %s21_s13  }
   0x8   : > { %p30_p4 = por %p29_p2, %p28_p1  ;;  %p35_p5 = scmp.eq.s32.totalorder %s287_s10, 0 }
   0x9   : > { %p310_p6 = scmp.lt.s32.totalorder %s409_s9, 2  ;;  %s84_s16 = sand.u32 1, %s405_s8  }
   0xa   : > { %p461_p7 = por %p35_p5, %p34_p3  ;;  %s291_s17 = sshll.u32 %s84_s16, 6 }
   0xb   : > { %s302_s18 = sshll.u32 %s409_s9, 10  ;;  %s88_s22 = scalar_lea.vmem [#allocation2], %s291_s17 }
   0xc   : > { %s613_s15 = scalar_select %p461_p7, 1, 0 }
   0xd   : > { %s470_s21 = scalar_lea.hbm %s610_s0, %s302_s18  ;;  %s96_s23 = sshll.u32 %s88_s22, 4  ;;  %s472_s23 = int_to_ptr.vmem [resolvable:$true] %s96_s23 }
   0xe   : > { %p474_p8 = pnand %p310_p6, %p30_p4  ;;  %s479_s25 = scalar_lea.sflag [#allocation3], %s84_s16 }
   0xf   : > { %s347_s26 = scalar_lea.hbm %s470_s21, 1024  ;;  %s352_s29 = scalar_lea.hbm %s610_s0, 2048 }
  0x10   : > { %p348_p10 = scmp.ne.s32.totalorder %s470_s21, %s347_s26  ;;  %p349_p11 = pneg %p474_p8 }
  0x11   : > { %p353_p0 = scmp.lt.s32.totalorder %s470_s21, %s610_s0  ;;  %p354_p1 = scmp.lt.s32.totalorder %s352_s29, %s347_s26 }
  0x12   : > { %p350_p12 = pnand %p349_p11, %p348_p10 }
  0x13   : > { %p355_p2 = por %p354_p1, %p353_p0 }
  0x14   : > { %p351_p13 = pneg %p350_p12 }
  0x16   : > { %p356_p3 = pnand %p355_p2, %p351_p13 }
  0x18   : > { %359 = shalt.err (!%p356_p3)
}
  0x19   : > { %s360_s3 = scalar_lea.vmem %s472_s23, 1024  ;;  %s411_s4 = smov [#allocation2]  }
  0x1a   : > { %p361_p4 = scmp.ne.s32.totalorder %s472_s23, %s360_s3  ;;  %s365_s5 = sshll.u32 %s411_s4, 4  ;;  %s366_s5 = int_to_ptr.vmem [resolvable:$false] %s365_s5 }
  0x1b   : > { %s367_s6 = scalar_lea.vmem %s366_s5, 2048  ;;  %p368_p10 = scmp.lt.s32.totalorder %s472_s23, %s366_s5 }
  0x1c   : > { %p363_p5 = pnand %p361_p4, %p349_p11  ;;  %p369_p12 = scmp.lt.s32.totalorder %s367_s6, %s360_s3 }
  0x1e   : > { %p364_p6 = pneg %p363_p5  ;;  %p370_p9 = por %p369_p12, %p368_p10 }
  0x20   : > { %p371_p7 = pnand %p370_p9, %p364_p6 }
  0x22   : > { %374 = shalt.err (!%p371_p7)
}
  0x23   : > { %s412_s12 = smov 128   ;;  %s413_s13 = smov 8  }
  0x24   : > { %309 = dma.hbm_to_vmem [thread:$0]  (!%p474_p8), %s470_s21, 1024, %s472_s23, %s479_s25, %s412_s12, %s412_s12, %s413_s13  }
  0x25   : > { %p104_p11 = scmp.lt.s32.totalorder %s409_s9, 3  ;;  %p615_p13 = scmp.ge.s32.totalorder %s409_s9, 1 }
  0x27   : > { %p105_p0 = pnand %p615_p13, %p104_p11 }
  0x28   : > { %s110_s16 = sand.u32 (!%p105_p0), 1, %s401_s7   ;;  %p616_p7 = scmp.ne.s32.totalorder (!%p105_p0), %s613_s15, 0 }
  0x29   : > { %108 = sbr.rel (%p105_p0) target bundleno = 177 (0xb1), region = 24  ;;  %s296_s17 = sshll.u32 (!%p105_p0), %s110_s16, 6 }
  0x2a   : > { %s111_s18 = scalar_lea.sflag (!%p105_p0), [#allocation3], %s110_s16  ;;  %s504_s19 = scalar_lea.vmem (!%p105_p0), [#allocation2], %s296_s17 }
  0x2e   : > { %392 = dma.done.wait (%p616_p7), %s111_s18, 1024  }
  0x2f   : > { %394 = vsyncadd (%p616_p7), %s111_s18, 4294966272  ;;  %s297_s20 = sshll.u32 %s287_s10, 2  ;;  %vm142_vm0 = vcmask 173056   ;;  %vm151_vm1 = vcmask 23552   ;;  %v171_v0 = vld [vmem:[%s504_s19 + $0x10] sm:$0xff]  ;;  %v169_v1 = vld [vmem:[%s504_s19] sm:$0xff] }
  0x30   : > { %p136_p8 = scmp.lt.s32.totalorder %s297_s20, 7  ;;  %v414_v2 = vmov 0.0   ;;  %s415_s9 = smov 3   ;;  %v172_v3 = vld [vmem:[%s504_s19 + $0x18] sm:$0xff]  ;;  %v170_v4 = vld [vmem:[%s504_s19 + $0x8] sm:$0xff]  ;;  %vm160_vm2 = vcmask 179352  }
  0x31   : > { %189 = vrot.lane.b32.xlu1 %v171_v0, %s415_s9  ;;  %185 = vrot.lane.b32.xlu0 %v169_v1, %s415_s9  ;;  %v174_v5 = vld [vmem:[%s504_s19 + $0x28] sm:$0xff]  ;;  %v173_v6 = vld [vmem:[%s504_s19 + $0x20] sm:$0xff]  ;;  %vm209_vm3 = vcmask 154648  }
  0x32   : > { %s622_s20 = smov (!%p136_p8, %s297_s20), 7  ;;  %v176_v7 = vld [vmem:[%s504_s19 + $0x38] sm:$0xff]  ;;  %v175_v8 = vld [vmem:[%s504_s19 + $0x30] sm:$0xff] }
  0x33   : > { %s303_s21 = smul.u32 24, %s622_s20 }
  0x35   : > { %s515_s24 = scalar_lea.vmem %s611_s1, %s303_s21  ;;  %191 = vrot.lane.b32.xlu1 %v172_v3, %s415_s9  ;;  %187 = vrot.lane.b32.xlu0 %v170_v4, %s415_s9 }
  0x36   : > { %143 = vst.msk [vmem:[%s515_s24] sm:$0x3] %vm142_vm0, %v414_v2  ;;  %147 = vst.msk [vmem:[%s515_s24 + $0x12] sm:$0x3] %vm142_vm0, %v414_v2 }
  0x37   : > { %152 = vst.msk [vmem:[%s515_s24 + $0x2] sm:$0xff] %vm151_vm1, %v414_v2  ;;  %153 = vst.msk [vmem:[%s515_s24 + $0xa] sm:$0xff] %vm151_vm1, %v414_v2 }
  0x38   : > { %144 = vst.msk [vmem:[%s515_s24 + $0x18] sm:$0x3] %vm142_vm0, %v414_v2  ;;  %148 = vst.msk [vmem:[%s515_s24 + $0x2a] sm:$0x3] %vm142_vm0, %v414_v2 }
  0x39   : > { %154 = vst.msk [vmem:[%s515_s24 + $0x1a] sm:$0xff] %vm151_vm1, %v414_v2  ;;  %155 = vst.msk [vmem:[%s515_s24 + $0x22] sm:$0xff] %vm151_vm1, %v414_v2  ;;  %195 = vrot.lane.b32.xlu1 %v174_v5, %s415_s9  ;;  %193 = vrot.lane.b32.xlu0 %v173_v6, %s415_s9 }
  0x3a   : > { %145 = vst.msk [vmem:[%s515_s24 + $0x30] sm:$0x3] %vm142_vm0, %v414_v2  ;;  %149 = vst.msk [vmem:[%s515_s24 + $0x42] sm:$0x3] %vm142_vm0, %v414_v2 }
  0x3b   : > { %156 = vst.msk [vmem:[%s515_s24 + $0x32] sm:$0xff] %vm151_vm1, %v414_v2  ;;  %157 = vst.msk [vmem:[%s515_s24 + $0x3a] sm:$0xff] %vm151_vm1, %v414_v2 }
  0x3c   : > { %146 = vst.msk [vmem:[%s515_s24 + $0x48] sm:$0x3] %vm142_vm0, %v414_v2  ;;  %150 = vst.msk [vmem:[%s515_s24 + $0x5a] sm:$0x3] %vm142_vm0, %v414_v2 }
  0x3d   : > { %158 = vst.msk [vmem:[%s515_s24 + $0x4a] sm:$0xff] %vm151_vm1, %v414_v2  ;;  %159 = vst.msk [vmem:[%s515_s24 + $0x52] sm:$0xff] %vm151_vm1, %v414_v2  ;;  %199 = vrot.lane.b32.xlu1 %v176_v7, %s415_s9  ;;  %197 = vrot.lane.b32.xlu0 %v175_v8, %s415_s9 }
  0x3e   : > { %161 = vst.msk [vmem:[%s515_s24 + $0x2] sm:$0xff] %vm160_vm2, %v414_v2  ;;  %162 = vst.msk [vmem:[%s515_s24 + $0xa] sm:$0xff] %vm160_vm2, %v414_v2 }
  0x3f   : > { %163 = vst.msk [vmem:[%s515_s24 + $0x1a] sm:$0xff] %vm160_vm2, %v414_v2  ;;  %164 = vst.msk [vmem:[%s515_s24 + $0x22] sm:$0xff] %vm160_vm2, %v414_v2 }
  0x40   : > { %165 = vst.msk [vmem:[%s515_s24 + $0x32] sm:$0xff] %vm160_vm2, %v414_v2  ;;  %166 = vst.msk [vmem:[%s515_s24 + $0x3a] sm:$0xff] %vm160_vm2, %v414_v2 }
  0x41   : > { %167 = vst.msk [vmem:[%s515_s24 + $0x4a] sm:$0xff] %vm160_vm2, %v414_v2  ;;  %168 = vst.msk [vmem:[%s515_s24 + $0x52] sm:$0xff] %vm160_vm2, %v414_v2 }
  0xa3   : > { %v190_v9 = vpop.permute.xlu1 %189  ;;  %v186_v10 = vpop.permute.xlu0 %185 }
  0xa4   : > { %210 = vst.msk [vmem:[%s515_s24 + $0x2] sm:$0xff] %vm209_vm3, %v186_v10  ;;  %212 = vst.msk [vmem:[%s515_s24 + $0x1a] sm:$0xff] %vm209_vm3, %v190_v9 }
  0xa7   : > { %v192_v11 = vpop.permute.xlu1 %191  ;;  %v188_v12 = vpop.permute.xlu0 %187 }
  0xa8   : > { %211 = vst.msk [vmem:[%s515_s24 + $0xa] sm:$0xff] %vm209_vm3, %v188_v12  ;;  %213 = vst.msk [vmem:[%s515_s24 + $0x22] sm:$0xff] %vm209_vm3, %v192_v11 }
  0xab   : > { %v196_v13 = vpop.permute.xlu1 %195  ;;  %v194_v14 = vpop.permute.xlu0 %193 }
  0xac   : > { %215 = vst.msk [vmem:[%s515_s24 + $0x3a] sm:$0xff] %vm209_vm3, %v196_v13  ;;  %214 = vst.msk [vmem:[%s515_s24 + $0x32] sm:$0xff] %vm209_vm3, %v194_v14 }
  0xaf   : > { %v200_v15 = vpop.permute.xlu1 %199  ;;  %v198_v16 = vpop.permute.xlu0 %197 }
  0xb0   : > { %217 = vst.msk [vmem:[%s515_s24 + $0x52] sm:$0xff] %vm209_vm3, %v200_v15  ;;  %216 = vst.msk [vmem:[%s515_s24 + $0x4a] sm:$0xff] %vm209_vm3, %v198_v16 }
  0xb1 PF: > { %p11_p9 = scmp.ge.s32.totalorder %s446_s11, 4   ;;  %s617_s6 = smov %s401_s7 }
  0xb2   : > { %s618_s7 = smov %s405_s8  ;;  %s619_s8 = smov %s456_s14 }
  0xb3   : > { %s620_s9 = smov %s446_s11  ;;  %13 = sbr.rel (!%p11_p9) target bundleno = 3 (0x3), region = 64 }
  0xb8   :  { %242 = vsyncpa [#allocation3], 1 }
  0xb9   :  { %244 = vsyncpa [#allocation3 + $0x1], 1 }

</bundles_post_ra>
